<compile_context>
chip_gen: v7x
topology: tpu7x:2x2x1
jax: 0.10.0
libtpu: 0.0.40
codegen_flags: <defaults>
</compile_context>

<pallas_src>
import jax
import jax.numpy as jnp
from jax.experimental import pallas as pl
from jax.experimental.pallas import tpu as pltpu


# ---------------------------------------------------------------------------
# Pallas kernel: (block_rows, K) @ (K, Hp)  + position-embedding(+bias) add
# ---------------------------------------------------------------------------
def _embed_kernel(x_ref, w_ref, pos_ref, o_ref):
    # x_ref:   (block_rows, K)  bf16   patches for Bt full batch elements
    # w_ref:   (K, Hp)          bf16   projection weight (resident)
    # pos_ref: (P, Hp)          f32    position embeddings + conv bias (resident)
    # o_ref:   (block_rows, Hp) f32
    acc = jnp.dot(x_ref[...], w_ref[...], preferred_element_type=jnp.float32)
    mt, hp = acc.shape
    p = pos_ref.shape[0]
    # block_rows = Bt * P, so broadcast pos over the Bt sub-blocks.
    out = acc.reshape(mt // p, p, hp) + pos_ref[...]
    o_ref[...] = out.reshape(mt, hp).astype(o_ref.dtype)


def _choose_block_batches(B, P, K, Hp, *, target_rows=512,
                          budget_bytes=12 * (1 << 20)):
    """Largest Bt dividing B s.t. Bt*P <= target_rows, fits a VMEM budget,
    and the resulting (Bt*P, K) block is legal (second-minor dim % 8 == 0,
    or the block equals the full array)."""
    def working_set(bt):
        mt = bt * P
        # 2x double-buffered input + 2x double-buffered output + resident W/pos
        return (2 * mt * K * 2) + (2 * mt * Hp * 4) + (K * Hp * 2) + (P * Hp * 4)

    valid = [bt for bt in range(1, B + 1)
             if B % bt == 0 and ((bt * P) % 8 == 0 or bt == B)]
    good = [bt for bt in valid
            if bt * P <= target_rows and working_set(bt) <= budget_bytes]
    if good:
        return max(good)
    return min(valid) if valid else B


# ---------------------------------------------------------------------------
# pallas_call wrapper
# ---------------------------------------------------------------------------
def patch_embeddings_pallas(patches2d, w_mat, pos_plus_b, *, block_rows):
    """patches2d: (B*P, K) bf16; w_mat: (K, Hp) bf16; pos_plus_b: (P, Hp) f32.

    Returns (B*P, Hp) f32 = patches2d @ w_mat + tile(pos_plus_b)."""
    M, K = patches2d.shape
    Hp = w_mat.shape[1]
    P = pos_plus_b.shape[0]
    assert M % block_rows == 0 and block_rows % P == 0

    # Explicit scoped-VMEM budget (safe for v7x's 64 MiB physical VMEM as well
    # as v5e/v6e; 3x headroom over the estimated double-buffered working set).
    est = (2 * block_rows * K * 2) + (2 * block_rows * Hp * 4) \
        + (K * Hp * 2) + (P * Hp * 4)
    vmem_limit = int(min(max(3 * est, 16 * (1 << 20)), 48 * (1 << 20)))

    grid = M // block_rows
    return pl.pallas_call(
        _embed_kernel,
        out_shape=jax.ShapeDtypeStruct((M, Hp), jnp.float32),
        grid_spec=pltpu.PrefetchScalarGridSpec(
            num_scalar_prefetch=0,
            grid=(grid,),
            in_specs=[
                pl.BlockSpec((block_rows, K), lambda i: (i, 0)),
                pl.BlockSpec((K, Hp), lambda i: (0, 0)),
                pl.BlockSpec((P, Hp), lambda i: (0, 0)),
            ],
            out_specs=pl.BlockSpec((block_rows, Hp), lambda i: (i, 0)),
        ),
        compiler_params=pltpu.CompilerParams(
            # M-tile axis is independent -> "parallel" (sharded across the two
            # TensorCores on v7x when the grid extent is >= 2).
            dimension_semantics=("parallel",),
            vmem_limit_bytes=vmem_limit,
        ),
    )(patches2d, w_mat, pos_plus_b)


# ---------------------------------------------------------------------------
# Embeddings forward (non-hybrid): glue in plain JAX, hot path in Pallas
# ---------------------------------------------------------------------------
def embeddings_forward(x_nchw, conv_w, conv_b, pos_emb):
    """
    x_nchw : (B, C, Himg, Wimg)        float32, NCHW (PyTorch convention)
    conv_w : (hidden, C, ph, pw)       patch_embeddings.weight
    conv_b : (hidden,)                 patch_embeddings.bias
    pos_emb: (1, n_patches, hidden)    position_embeddings
    returns (embeddings, features) with features = None (non-hybrid branch)
    """
    B, C, Hin, Win = x_nchw.shape
    hidden, _, ph, pw = conv_w.shape
    Hg, Wg = Hin // ph, Win // pw
    P = Hg * Wg
    K = C * ph * pw

    # im2col for non-overlapping patches, materialized directly in bf16 to halve
    # the extra HBM traffic of the rearranged copy.
    # (B, C, Hg, ph, Wg, pw) -> (B, Hg, Wg, C, ph, pw) -> (B*P, K)
    xb = x_nchw.astype(jnp.bfloat16)
    patches = xb.reshape(B, C, Hg, ph, Wg, pw)
    patches = patches.transpose(0, 2, 4, 1, 3, 5).reshape(B * P, K)

    # Conv weight -> matmul weight (K, hidden), bf16 for the MXU fast path.
    w_mat = conv_w.reshape(hidden, K).T.astype(jnp.bfloat16)

    # Fold the (batch-invariant) conv bias into the position embeddings once.
    pos_plus_b = (pos_emb[0] + conv_b[None, :]).astype(jnp.float32)

    # Lane-dense hidden dim: pad to a multiple of 128 (no-op for realistic
    # hidden sizes such as 768); output is sliced back below.
    Hpad = pl.cdiv(hidden, 128) * 128
    if Hpad != hidden:
        w_mat = jnp.pad(w_mat, ((0, 0), (0, Hpad - hidden)))
        pos_plus_b = jnp.pad(pos_plus_b, ((0, 0), (0, Hpad - hidden)))

    Bt = _choose_block_batches(B, P, K, Hpad)
    out2d = patch_embeddings_pallas(patches, w_mat, pos_plus_b,
                                    block_rows=Bt * P)

    out = out2d.reshape(B, P, Hpad)
    if Hpad != hidden:
        out = out[:, :, :hidden]
    # dropout(drop_rate=0.0) is identity.
    return out, None


# ---------------------------------------------------------------------------
# Reference (plain JAX, f32) for a correctness check
# ---------------------------------------------------------------------------
def embeddings_reference(x_nchw, conv_w, conv_b, pos_emb):
    B, C, Hin, Win = x_nchw.shape
    hidden, _, ph, pw = conv_w.shape
    y = jax.lax.conv_general_dilated(
        x_nchw, conv_w,
        window_strides=(ph, pw), padding="VALID",
        dimension_numbers=("NCHW", "OIHW", "NCHW"),
    ) + conv_b.reshape(1, hidden, 1, 1)
    y = y.reshape(B, hidden, -1).transpose(0, 2, 1)   # flatten(2).transpose(-1,-2)
    return y + pos_emb


if __name__ == "__main__":
    # Small config consistent with the module: img_size=16, patch_size=4,
    # in_channels=4, hidden_size=32, grid=None (non-hybrid), drop_rate=0.0
    B, C, IMG, PATCH, HIDDEN = 2, 4, 16, 4, 32
    n_patches = (IMG // PATCH) * (IMG // PATCH)

    key = jax.random.PRNGKey(0)
    kx, kw, kb, kp = jax.random.split(key, 4)

    x = jax.random.normal(kx, (B, C, IMG, IMG), dtype=jnp.float32)
    conv_w = jax.random.normal(kw, (HIDDEN, C, PATCH, PATCH), dtype=jnp.float32) * 0.05
    conv_b = jax.random.normal(kb, (HIDDEN,), dtype=jnp.float32) * 0.05
    # nn.Parameter(torch.zeros(...)) in __init__; use small random values here
    # (deterministic synthetic init) so the add path is exercised.
    pos_emb = jax.random.normal(kp, (1, n_patches, HIDDEN), dtype=jnp.float32) * 0.02

    emb, feats = jax.jit(embeddings_forward)(x, conv_w, conv_b, pos_emb)
    jax.block_until_ready(emb)

    ref = embeddings_reference(x, conv_w, conv_b, pos_emb)
    assert emb.shape == (B, n_patches, HIDDEN), emb.shape
    assert feats is None
    # bf16 matmul inputs with f32 accumulation -> loosened tolerance vs f32 ref.
    assert jnp.allclose(emb, ref, atol=3e-2, rtol=3e-2), \
        float(jnp.max(jnp.abs(emb - ref)))

    print("KERNEL_OK")
</pallas_src>

<mosaic_0001>
module attributes {stable_mosaic.version = 11 : i64} {
  func.func @_embed_kernel(%arg0: i32, %arg1: memref<32x64xbf16, #tpu.memory_space<vmem>>, %arg2: memref<64x128xbf16, #tpu.memory_space<vmem>>, %arg3: memref<16x128xf32, #tpu.memory_space<vmem>>, %arg4: memref<32x128xf32, #tpu.memory_space<vmem>>) attributes {dimension_semantics = [#tpu.dimension_semantics<parallel>], iteration_bounds = array<i64: 1>, scalar_prefetch = 0 : i64, scratch_operands = 0 : i64, tpu.core_type = #tpu.core_type<tc>, window_params = [{transform_indices = @transform_0, window_bounds = array<i64: 32, 64>}, {pipeline_mode = #tpu.pipeline_mode<synchronous>, transform_indices = @transform_1, window_bounds = array<i64: 64, 128>}, {pipeline_mode = #tpu.pipeline_mode<synchronous>, transform_indices = @transform_2, window_bounds = array<i64: 16, 128>}, {transform_indices = @transform_3, window_bounds = array<i64: 32, 128>}]} {
    %c0 = arith.constant 0 : index
    %c0_0 = arith.constant 0 : index
    %0 = vector.load %arg1[%c0, %c0_0] : memref<32x64xbf16, #tpu.memory_space<vmem>>, vector<32x64xbf16>
    %c0_1 = arith.constant 0 : index
    %c0_2 = arith.constant 0 : index
    %1 = vector.load %arg2[%c0_1, %c0_2] : memref<64x128xbf16, #tpu.memory_space<vmem>>, vector<64x128xbf16>
    %cst = arith.constant dense<0.000000e+00> : vector<32x128xf32>
    %2 = tpu.matmul %0, %1, %cst {dimension_numbers = #tpu.dot_dimension_numbers<[1], [0], [0], [1], [0, 0, 1, 1], [], []>} : vector<32x64xbf16>, vector<64x128xbf16>, vector<32x128xf32> -> vector<32x128xf32>
    %3 = vector.shape_cast %2 : vector<32x128xf32> to vector<2x16x128xf32>
    %c0_3 = arith.constant 0 : index
    %c0_4 = arith.constant 0 : index
    %4 = vector.load %arg3[%c0_3, %c0_4] : memref<16x128xf32, #tpu.memory_space<vmem>>, vector<16x128xf32>
    %5 = vector.shape_cast %4 : vector<16x128xf32> to vector<1x16x128xf32>
    %6 = vector.broadcast %5 : vector<1x16x128xf32> to vector<2x16x128xf32>
    %7 = arith.addf %3, %6 : vector<2x16x128xf32>
    %8 = vector.shape_cast %7 : vector<2x16x128xf32> to vector<32x128xf32>
    %c0_5 = arith.constant 0 : index
    %c0_6 = arith.constant 0 : index
    %9 = vector.load %arg4[%c0_5, %c0_6] : memref<32x128xf32, #tpu.memory_space<vmem>>, vector<32x128xf32>
    tpu.vector_store %arg4[%c0_5, %c0_6], %8 {strides = array<i32>} : memref<32x128xf32, #tpu.memory_space<vmem>>, vector<32x128xf32>,
    return
  }
  func.func @transform_0(%arg0: i32) -> (i32, i32) {
    %c0_i32 = arith.constant 0 : i32
    %c0_i32_0 = arith.constant 0 : i32
    return %arg0, %c0_i32 : i32, i32
  }
  func.func @transform_1(%arg0: i32) -> (i32, i32) {
    %c0_i32 = arith.constant 0 : i32
    %c0_i32_0 = arith.constant 0 : i32
    %c0_i32_1 = arith.constant 0 : i32
    return %c0_i32, %c0_i32_0 : i32, i32
  }
  func.func @transform_2(%arg0: i32) -> (i32, i32) {
    %c0_i32 = arith.constant 0 : i32
    %c0_i32_0 = arith.constant 0 : i32
    %c0_i32_1 = arith.constant 0 : i32
    return %c0_i32, %c0_i32_0 : i32, i32
  }
  func.func @transform_3(%arg0: i32) -> (i32, i32) {
    %c0_i32 = arith.constant 0 : i32
    %c0_i32_0 = arith.constant 0 : i32
    return %arg0, %c0_i32 : i32, i32
  }
}

</mosaic_0001>

<bundles_post_ra>
// kernel: embeddings_forward.1
= control target key start
LH: loop header
LB: loop body
LE: loop exit
PB: predicated region body
PF: predicated region fallthrough
CT: control target
= control target key end

     0   :  { %vm62_vm0 = vcmask 523264   ;;  %s262_s0 = inlined_call_operand.vmem [shape: bf16[32,64], index: 0, kind: input, shape index: {}]   ;;  %s263_s1 = inlined_call_operand.vmem [shape: bf16[64,128], index: 1, kind: input, shape index: {}]   ;;  %s264_s2 = inlined_call_operand.vmem [shape: f32[16,128], index: 2, kind: input, shape index: {}]   ;;  %s265_s3 = inlined_call_operand.hbm [shape: f32[32,128], index: 3, kind: output, shape index: {}]  }
   0x1   :  { %v173_v0 = vld [vmem:[%s263_s1] sm:$0xff]   ;;  %v174_v1 = vld [vmem:[%s263_s1 + $0x8] sm:$0xff]   ;;  %v175_v2 = vld [vmem:[%s263_s1 + $0x10] sm:$0xff]  }
   0x2   :  { %158 = vmatprep.subr.bf16.mxu0 %v173_v0  ;;  %v177_v3 = vld [vmem:[%s262_s0] sm:$0xff]  }
   0x3   :  { %159 = vmatpush3.bf16.msra.mxu0 %v173_v0  ;;  %166 = vmatprep.mubr.msk.bf16.mxu0 %vm62_vm0, %v177_v3 }
   0x4   :  { %160 = vmatprep.subr.bf16.mxu0 %v174_v1 }
   0x5   :  { %8 = vsyncpa [#allocation3], 0  ;;  %v176_v4 = vld [vmem:[%s263_s1 + $0x18] sm:$0xff]   ;;  %v178_v5 = vld [vmem:[%s262_s0 + $0x8] sm:$0xff]   ;;  %s203_s28 = smov [#allocation2]  }
   0x6   :  { %v118_v6 = vld [vmem:[%s264_s2] sm:$0xff]  ;;  %v119_v8 = vld [vmem:[%s264_s2 + $0x8] sm:$0xff]  ;;  %s133_s29 = sshll.u32 %s203_s28, 4  ;;  %s134_s29 = int_to_ptr.vmem [resolvable:$true] %s133_s29 }
   0x7   :  { %161 = vmatpush3.bf16.msra.mxu0 %v174_v1  ;;  %s179_s0 = scalar_lea.vmem %s134_s29, 512  ;;  %p184_p1 = scmp.lt.s32.totalorder %s134_s29, %s134_s29 }
   0x8   :  { %162 = vmatprep.subr.bf16.mxu0 %v175_v2  ;;  %p180_p0 = scmp.ne.s32.totalorder %s134_s29, %s179_s0  ;;  %p185_p2 = scmp.lt.s32.totalorder %s179_s0, %s179_s0 }
   0xa   :  { %p186_p3 = por %p185_p2, %p184_p1 }
   0xb   :  { %163 = vmatpush3.bf16.msra.mxu0 %v175_v2 }
   0xc   :  { %164 = vmatprep.subr.bf16.mxu0 %v176_v4  ;;  %p187_p4 = pnand %p186_p3, %p180_p0 }
   0xf   :  { %165 = vmatpush3.bf16.msra.mxu0 %v176_v4 }
  0x12   :  { %167 = vmatmul.mubr.msk.bf16.vlgmr.msra.gmra.mrb[0].mxu0 %vm62_vm0, %v178_v5 }
  0xe5   :  { %v168_v7 = vpop.f32.mrb[0].mxu0 }
  0xe6   :  { %v122_v9 = vadd.f32 %v168_v7, %v118_v6  ;;  %v103_v10 = vpop.f32.mrb[1].mxu0 }
  0xe7   :  { %v120_v11 = vadd.f32 %v118_v6, %v103_v10  ;;  %v169_v12 = vpop.f32.mrb[2].mxu0 }
  0xe8   :  { %126 = vst [vmem:[#allocation2 + $0x10] sm:$0xff] %v122_v9  ;;  %v123_v13 = vadd.f32 %v169_v12, %v119_v8  ;;  %v106_v14 = vpop.f32.mrb[3].mxu0 }
  0xe9   :  { %124 = vst [vmem:[#allocation2] sm:$0xff] %v120_v11  ;;  %v121_v15 = vadd.f32 %v119_v8, %v106_v14 }
  0xea   :  { %127 = vst [vmem:[#allocation2 + $0x18] sm:$0xff] %v123_v13 }
  0xeb   :  { %125 = vst [vmem:[#allocation2 + $0x8] sm:$0xff] %v121_v15 }
  0xec   :  { %190 = shalt.err (!%p187_p4)
}
  0xed   :  { %s191_s30 = scalar_lea.hbm %s265_s3, 512 }
  0xee   :  { %p192_p5 = scmp.ne.s32.totalorder %s265_s3, %s191_s30  ;;  %p195_p6 = scmp.lt.u32.totalorder %s191_s30, %s265_s3 }
  0xf0   :  { %p197_p7 = pnand %p195_p6, %p192_p5 }
  0xf2   :  { %200 = shalt.err (!%p197_p7)
}
  0xf3   :  { %s204_s8 = smov 128   ;;  %s205_s9 = smov 8  }
  0xf4   :  { %139 = dma.vmem_to_hbm [thread:$0]  %s134_s29, 512, %s265_s3, [#allocation3], %s204_s8, %s204_s8, %s205_s9  }
  0xf5   :  { %201 = dma.done.wait [#allocation3], 512  }
  0xf6   :  { %202 = vsyncadd [#allocation3], 4294966784 }
  0xf7   :  { %143 = vsyncpa [#allocation3], 1 }

</bundles_post_ra>
